<compile_context>
chip_gen: v5e
topology: v5e:2x2
jax: 0.10.0
libtpu: 0.0.40
codegen_flags: <defaults>
</compile_context>

<pallas_src>
import jax
import jax.numpy as jnp
from jax.experimental import pallas as pl
from jax.experimental.pallas import tpu as pltpu

LANES = 128
SUBLANES = 8
MAX_TILE_ROWS = 2048  # 2048 * 128 * 4B = 1 MiB per pipelined input buffer


# --------------------------------------------------------------------------
# In-kernel helpers
# --------------------------------------------------------------------------
def _softplus(x, fast=False):
    """Numerically stable log(1 + exp(x)); optionally evaluated in bf16 (EUP)."""
    if fast:
        xb = x.astype(jnp.bfloat16)
        sp = jnp.maximum(xb, 0) + jnp.log1p(jnp.exp(-jnp.abs(xb)))
        return sp.astype(jnp.float32)
    return jnp.maximum(x, 0.0) + jnp.log1p(jnp.exp(-jnp.abs(x)))


def _vsum(x, tile_r):
    """(tile_r, LANES) f32 -> (8, LANES) partial sum: pure vreg-wise VPU adds."""
    return x.reshape(tile_r // SUBLANES, SUBLANES, LANES).sum(axis=0)


def _valid_mask(tile_idx, tile_r, n_true):
    """(tile_r, LANES) f32 mask: 1.0 for real elements, 0.0 for zero-padding."""
    row0 = tile_idx * tile_r
    rows = jax.lax.broadcasted_iota(jnp.int32, (tile_r, LANES), 0) + row0
    lanes = jax.lax.broadcasted_iota(jnp.int32, (tile_r, LANES), 1)
    return ((rows * LANES + lanes) < n_true).astype(jnp.float32)


# --------------------------------------------------------------------------
# Kernels
# --------------------------------------------------------------------------
def _make_softplus_kernel(mode, tile_r, n_true, has_pad, fast):
    """Single-pass streaming softplus loss for RSGAN / SGAN (no means needed)."""
    inv_n = 1.0 / float(n_true)
    if mode == 'RSGAN':
        scale_d, scale_g = inv_n, inv_n
    elif mode == 'SGAN':
        scale_d, scale_g = 0.5 * inv_n, inv_n
    else:
        raise ValueError(f"unknown gan_mode: {mode}")

    def kernel(dr_ref, df_ref, dfg_ref, out_ref, acc_ref):
        i = pl.program_id(0)
        nt = pl.num_programs(0)
        is_last = i == nt - 1

        @pl.when(i == 0)
        def _():
            acc_ref[...] = jnp.zeros_like(acc_ref)

        dr = dr_ref[...].astype(jnp.float32)
        df = df_ref[...].astype(jnp.float32)
        dfg = dfg_ref[...].astype(jnp.float32)

        if mode == 'RSGAN':
            # BCE(dr - df, 1) and BCE(dfg - dr, 1)
            td = _softplus(df - dr, fast)
            tg = _softplus(dr - dfg, fast)
        else:  # SGAN
            td = _softplus(-dr, fast) + _softplus(df, fast)
            tg = _softplus(-dfg, fast)

        if has_pad:
            # Padding is confined to the last tile: mask only there.
            @pl.when(is_last)
            def _():
                m = _valid_mask(i, tile_r, n_true)
                acc_ref[0] += _vsum(td * m, tile_r)
                acc_ref[1] += _vsum(tg * m, tile_r)

            @pl.when(jnp.logical_not(is_last))
            def _():
                acc_ref[0] += _vsum(td, tile_r)
                acc_ref[1] += _vsum(tg, tile_r)
        else:
            acc_ref[0] += _vsum(td, tile_r)
            acc_ref[1] += _vsum(tg, tile_r)

        @pl.when(is_last)
        def _():
            out_ref[0] = jnp.sum(acc_ref[0]) * scale_d
            out_ref[1] = jnp.sum(acc_ref[1]) * scale_g

    return kernel


def _make_rasgan_kernel(tile_r, n_true, has_pad, fast):
    """Fused two-pass RaSGAN: grid (2, num_tiles).

    Pass 0 streams the tiles and accumulates the three means (SMEM scratch);
    pass 1 re-streams the same tiles and accumulates the softplus losses.
    """
    inv_n = 1.0 / float(n_true)
    half_inv_n = 0.5 * inv_n

    def kernel(dr_ref, df_ref, dfg_ref, out_ref, sum_acc, sp_acc, means):
        p = pl.program_id(0)      # pass index (0 = means, 1 = softplus)
        i = pl.program_id(1)      # tile index
        nt = pl.num_programs(1)
        is_last = i == nt - 1

        @pl.when(jnp.logical_and(p == 0, i == 0))
        def _():
            sum_acc[...] = jnp.zeros_like(sum_acc)
            sp_acc[...] = jnp.zeros_like(sp_acc)

        dr = dr_ref[...].astype(jnp.float32)
        df = df_ref[...].astype(jnp.float32)
        dfg = dfg_ref[...].astype(jnp.float32)

        @pl.when(p == 0)
        def _():
            # Zero padding contributes 0 to raw sums: no mask needed here.
            sum_acc[0] += _vsum(dr, tile_r)
            sum_acc[1] += _vsum(df, tile_r)
            sum_acc[2] += _vsum(dfg, tile_r)

            @pl.when(is_last)
            def _():
                means[0] = jnp.sum(sum_acc[0]) * inv_n
                means[1] = jnp.sum(sum_acc[1]) * inv_n
                means[2] = jnp.sum(sum_acc[2]) * inv_n

        @pl.when(p == 1)
        def _():
            mr = means[0]
            mf = means[1]
            mfg = means[2]
            td = _softplus(mf - dr, fast) + _softplus(df - mr, fast)
            tg = _softplus(dr - mfg, fast) + _softplus(mr - dfg, fast)

            if has_pad:
                @pl.when(is_last)
                def _():
                    m = _valid_mask(i, tile_r, n_true)
                    sp_acc[0] += _vsum(td * m, tile_r)
                    sp_acc[1] += _vsum(tg * m, tile_r)

                @pl.when(jnp.logical_not(is_last))
                def _():
                    sp_acc[0] += _vsum(td, tile_r)
                    sp_acc[1] += _vsum(tg, tile_r)
            else:
                sp_acc[0] += _vsum(td, tile_r)
                sp_acc[1] += _vsum(tg, tile_r)

            @pl.when(is_last)
            def _():
                out_ref[0] = jnp.sum(sp_acc[0]) * half_inv_n
                out_ref[1] = jnp.sum(sp_acc[1]) * half_inv_n

    return kernel


def _make_ralsgan_kernel(tile_r, n_true):
    """Single-pass RaLSGAN via first/second moments.

    mean((x - c)^2) = E[x^2] - 2 c E[x] + c^2 (exact algebraically; zero
    padding contributes 0 to all sums, so no mask is needed).
    # TODO(synk): switch to a direct two-pass (x - c)^2 form if discriminator
    # logits can be huge (|mean| >> std) and cancellation becomes a concern.
    """
    inv_n = 1.0 / float(n_true)

    def kernel(dr_ref, df_ref, dfg_ref, out_ref, acc_ref):
        i = pl.program_id(0)
        nt = pl.num_programs(0)

        @pl.when(i == 0)
        def _():
            acc_ref[...] = jnp.zeros_like(acc_ref)

        dr = dr_ref[...].astype(jnp.float32)
        df = df_ref[...].astype(jnp.float32)
        dfg = dfg_ref[...].astype(jnp.float32)

        acc_ref[0] += _vsum(dr, tile_r)
        acc_ref[1] += _vsum(dr * dr, tile_r)
        acc_ref[2] += _vsum(df, tile_r)
        acc_ref[3] += _vsum(df * df, tile_r)
        acc_ref[4] += _vsum(dfg, tile_r)
        acc_ref[5] += _vsum(dfg * dfg, tile_r)

        @pl.when(i == nt - 1)
        def _():
            e_r = jnp.sum(acc_ref[0]) * inv_n
            e_r2 = jnp.sum(acc_ref[1]) * inv_n
            e_f = jnp.sum(acc_ref[2]) * inv_n
            e_f2 = jnp.sum(acc_ref[3]) * inv_n
            e_g = jnp.sum(acc_ref[4]) * inv_n
            e_g2 = jnp.sum(acc_ref[5]) * inv_n
            c1 = e_f + 1.0   # (dr - mf - 1)^2
            c2 = e_r - 1.0   # (df - mr + 1)^2
            c3 = e_g - 1.0   # (dr - mfg + 1)^2
            c4 = e_r + 1.0   # (dfg - mr - 1)^2
            out_ref[0] = 0.5 * ((e_r2 - 2.0 * c1 * e_r + c1 * c1)
                                + (e_f2 - 2.0 * c2 * e_f + c2 * c2))
            out_ref[1] = 0.5 * ((e_r2 - 2.0 * c3 * e_r + c3 * c3)
                                + (e_g2 - 2.0 * c4 * e_g + c4 * c4))

    return kernel


# --------------------------------------------------------------------------
# Wrapper
# --------------------------------------------------------------------------
def _layout(n):
    """Return (rows, tile_r, needs_pad) for the lane-dense (rows, 128) slab.

    Avoids any wrapper-side copy whenever the flattened size is (8*128)-aligned
    and a reasonably large divisor tile exists; otherwise falls back to zero
    padding (pad then lives entirely inside the last tile).
    """
    if n % (SUBLANES * LANES) == 0:
        rows = n // LANES
        if rows <= MAX_TILE_ROWS:
            return rows, rows, False            # single tile, free reshape
        for t in (2048, 1024, 512, 256):
            if rows % t == 0:
                return rows, t, False           # divisor tile, free reshape
    base_rows = pl.cdiv(n, SUBLANES * LANES) * SUBLANES
    tile_r = min(MAX_TILE_ROWS, base_rows)
    rows = pl.cdiv(base_rows, tile_r) * tile_r
    return rows, tile_r, True


def _to_slab(x, rows, needs_pad):
    flat = jnp.ravel(x)
    if needs_pad:
        flat = jnp.pad(flat, (0, rows * LANES - flat.shape[0]))
    return flat.reshape(rows, LANES)            # free reshape when no pad


def gan_loss(d_real, d_fake, d_fake_for_g, mode: str = 'RaSGAN',
             fast_softplus: bool = False):
    """Pallas implementation of GAN_Loss.forward.  Returns (loss_D, loss_G).

    fast_softplus=True evaluates the softplus transcendentals in bf16 (useful
    on v6e/v7x where the EUP is the bottleneck); keep False on v5e or when
    full f32 accuracy is required.
    """
    n = d_real.size
    rows, tile_r, needs_pad = _layout(n)
    num_tiles = rows // tile_r

    slabs = [_to_slab(x, rows, needs_pad) for x in (d_real, d_fake, d_fake_for_g)]
    itemsize = jnp.dtype(d_real.dtype).itemsize

    smem_out = pl.BlockSpec(memory_space=pltpu.MemorySpace.SMEM)

    if mode == 'RaSGAN':
        out = pl.pallas_call(
            _make_rasgan_kernel(tile_r, n, needs_pad, fast_softplus),
            out_shape=jax.ShapeDtypeStruct((2,), jnp.float32),
            grid=(2, num_tiles),
            in_specs=[pl.BlockSpec((tile_r, LANES), lambda p, i: (i, 0))] * 3,
            out_specs=smem_out,
            scratch_shapes=[pltpu.VMEM((3, SUBLANES, LANES), jnp.float32),
                            pltpu.VMEM((2, SUBLANES, LANES), jnp.float32),
                            pltpu.SMEM((3,), jnp.float32)],
            compiler_params=pltpu.CompilerParams(
                dimension_semantics=("arbitrary", "arbitrary")),
            cost_estimate=pl.CostEstimate(
                flops=20 * n, transcendentals=8 * n,
                bytes_accessed=6 * n * itemsize),
        )(*slabs)
        return out[0], out[1]

    tiled = pl.BlockSpec((tile_r, LANES), lambda i: (i, 0))
    cparams = pltpu.CompilerParams(dimension_semantics=("arbitrary",))

    if mode == 'RaLSGAN':
        out = pl.pallas_call(
            _make_ralsgan_kernel(tile_r, n),
            out_shape=jax.ShapeDtypeStruct((2,), jnp.float32),
            grid=(num_tiles,),
            in_specs=[tiled] * 3,
            out_specs=smem_out,
            scratch_shapes=[pltpu.VMEM((6, SUBLANES, LANES), jnp.float32)],
            compiler_params=cparams,
            cost_estimate=pl.CostEstimate(
                flops=12 * n, transcendentals=0,
                bytes_accessed=3 * n * itemsize),
        )(*slabs)
        return out[0], out[1]

    if mode in ('RSGAN', 'SGAN'):
        transc = 4 * n if mode == 'RSGAN' else 6 * n
        out = pl.pallas_call(
            _make_softplus_kernel(mode, tile_r, n, needs_pad, fast_softplus),
            out_shape=jax.ShapeDtypeStruct((2,), jnp.float32),
            grid=(num_tiles,),
            in_specs=[tiled] * 3,
            out_specs=smem_out,
            scratch_shapes=[pltpu.VMEM((2, SUBLANES, LANES), jnp.float32)],
            compiler_params=cparams,
            cost_estimate=pl.CostEstimate(
                flops=10 * n, transcendentals=transc,
                bytes_accessed=3 * n * itemsize),
        )(*slabs)
        return out[0], out[1]

    raise ValueError(f"unknown gan_mode: {mode}")


# --------------------------------------------------------------------------
# Pure-JAX reference (mirrors the PyTorch forward) + self-test
# --------------------------------------------------------------------------
def _gan_loss_ref(d_real, d_fake, d_fake_for_g, mode: str = 'RaSGAN'):
    dr = d_real.astype(jnp.float32)
    df = d_fake.astype(jnp.float32)
    dfg = d_fake_for_g.astype(jnp.float32)
    bce1 = lambda x: jnp.mean(_softplus(-x))   # BCEWithLogits(x, 1)
    bce0 = lambda x: jnp.mean(_softplus(x))    # BCEWithLogits(x, 0)
    if mode == 'RSGAN':
        return bce1(dr - df), bce1(dfg - dr)
    if mode == 'SGAN':
        return (bce1(dr) + bce0(df)) * 0.5, bce1(dfg)
    if mode == 'RaSGAN':
        mr, mf, mfg = jnp.mean(dr), jnp.mean(df), jnp.mean(dfg)
        return ((bce1(dr - mf) + bce0(df - mr)) * 0.5,
                (bce0(dr - mfg) + bce1(dfg - mr)) * 0.5)
    if mode == 'RaLSGAN':
        mr, mf, mfg = jnp.mean(dr), jnp.mean(df), jnp.mean(dfg)
        return ((jnp.mean((dr - mf - 1.0) ** 2) + jnp.mean((df - mr + 1.0) ** 2)) * 0.5,
                (jnp.mean((dr - mfg + 1.0) ** 2) + jnp.mean((dfg - mr - 1.0) ** 2)) * 0.5)
    raise ValueError(mode)


if __name__ == "__main__":
    key = jax.random.PRNGKey(0)
    ok = True
    # Shapes exercise: aligned single tile; ragged (pad + mask) single tile;
    # aligned multi-tile (no pad, no copy); ragged multi-tile (mask applied
    # only on the last tile).
    shapes = [(2, 4, 16, 16), (3, 1, 5, 7), (4, 4, 128, 256), (2, 8, 128, 130)]
    for shape in shapes:
        k1, k2, k3, key = jax.random.split(key, 4)
        d_real = jax.random.normal(k1, shape, dtype=jnp.float32)
        d_fake = jax.random.normal(k2, shape, dtype=jnp.float32)
        d_fake_for_g = jax.random.normal(k3, shape, dtype=jnp.float32)

        for mode in ('RaSGAN', 'RSGAN', 'SGAN', 'RaLSGAN'):
            loss_d, loss_g = gan_loss(d_real, d_fake, d_fake_for_g, mode=mode)
            loss_d = jax.block_until_ready(loss_d)
            loss_g = jax.block_until_ready(loss_g)
            ref_d, ref_g = _gan_loss_ref(d_real, d_fake, d_fake_for_g, mode=mode)
            if not (jnp.allclose(loss_d, ref_d, atol=5e-5, rtol=5e-5)
                    and jnp.allclose(loss_g, ref_g, atol=5e-5, rtol=5e-5)):
                ok = False
                print(f"MISMATCH shape={shape} mode={mode}: "
                      f"pallas=({loss_d}, {loss_g}) ref=({ref_d}, {ref_g})")

    # Exercise the optional bf16-EUP softplus path (v6e/v7x lever) with a
    # loose tolerance — it intentionally trades a little accuracy for EUP
    # throughput.
    fd, fg = gan_loss(d_real, d_fake, d_fake_for_g, mode='RaSGAN',
                      fast_softplus=True)
    fd = jax.block_until_ready(fd)
    fg = jax.block_until_ready(fg)
    ref_d, ref_g = _gan_loss_ref(d_real, d_fake, d_fake_for_g, mode='RaSGAN')
    if not (jnp.allclose(fd, ref_d, atol=2e-2, rtol=2e-2)
            and jnp.allclose(fg, ref_g, atol=2e-2, rtol=2e-2)):
        ok = False
        print(f"MISMATCH fast_softplus RaSGAN: pallas=({fd}, {fg}) "
              f"ref=({ref_d}, {ref_g})")

    if ok:
        print("KERNEL_OK")
</pallas_src>

<mosaic_0001>
module attributes {stable_mosaic.version = 11 : i64} {
  func.func @kernel(%arg0: i32, %arg1: i32, %arg2: memref<16x128xf32, #tpu.memory_space<vmem>>, %arg3: memref<16x128xf32, #tpu.memory_space<vmem>>, %arg4: memref<16x128xf32, #tpu.memory_space<vmem>>, %arg5: memref<2xf32, #tpu.memory_space<smem>>, %arg6: memref<3x8x128xf32, #tpu.memory_space<vmem>>, %arg7: memref<2x8x128xf32, #tpu.memory_space<vmem>>, %arg8: memref<3xf32, #tpu.memory_space<smem>>) attributes {dimension_semantics = [#tpu.dimension_semantics<arbitrary>, #tpu.dimension_semantics<arbitrary>], iteration_bounds = array<i64: 2, 1>, scalar_prefetch = 0 : i64, scratch_operands = 3 : i64, tpu.core_type = #tpu.core_type<tc>, window_params = [{transform_indices = @transform_0, window_bounds = array<i64: 16, 128>}, {transform_indices = @transform_1, window_bounds = array<i64: 16, 128>}, {transform_indices = @transform_2, window_bounds = array<i64: 16, 128>}, {transform_indices = @transform_3, window_bounds = array<i64: 2>}]} {
    %c0_i32 = arith.constant 0 : i32
    %0 = arith.cmpi eq, %arg1, %c0_i32 : i32
    %c0_i32_0 = arith.constant 0 : i32
    %1 = arith.cmpi eq, %arg0, %c0_i32_0 : i32
    %c0_i32_1 = arith.constant 0 : i32
    %2 = arith.cmpi eq, %arg1, %c0_i32_1 : i32
    %3 = arith.andi %1, %2 : i1
    %4 = arith.extui %3 : i1 to i32
    %c0_i32_2 = arith.constant 0 : i32
    %5 = arith.cmpi ne, %4, %c0_i32_2 : i32
    scf.if %5 {
      %cst = arith.constant 0.000000e+00 : f32
      %15 = vector.broadcast %cst : f32 to vector<3x8x128xf32>
      %c0_11 = arith.constant 0 : index
      %c0_12 = arith.constant 0 : index
      %c0_13 = arith.constant 0 : index
      %16 = vector.load %arg6[%c0_11, %c0_12, %c0_13] : memref<3x8x128xf32, #tpu.memory_space<vmem>>, vector<3x8x128xf32>
      tpu.vector_store %arg6[%c0_11, %c0_12, %c0_13], %15 {strides = array<i32>} : memref<3x8x128xf32, #tpu.memory_space<vmem>>, vector<3x8x128xf32>,
      %cst_14 = arith.constant 0.000000e+00 : f32
      %17 = vector.broadcast %cst_14 : f32 to vector<2x8x128xf32>
      %c0_15 = arith.constant 0 : index
      %c0_16 = arith.constant 0 : index
      %c0_17 = arith.constant 0 : index
      %18 = vector.load %arg7[%c0_15, %c0_16, %c0_17] : memref<2x8x128xf32, #tpu.memory_space<vmem>>, vector<2x8x128xf32>
      tpu.vector_store %arg7[%c0_15, %c0_16, %c0_17], %17 {strides = array<i32>} : memref<2x8x128xf32, #tpu.memory_space<vmem>>, vector<2x8x128xf32>,
    } else {
    }
    %c0 = arith.constant 0 : index
    %c0_3 = arith.constant 0 : index
    %6 = vector.load %arg2[%c0, %c0_3] : memref<16x128xf32, #tpu.memory_space<vmem>>, vector<16x128xf32>
    %c0_4 = arith.constant 0 : index
    %c0_5 = arith.constant 0 : index
    %7 = vector.load %arg3[%c0_4, %c0_5] : memref<16x128xf32, #tpu.memory_space<vmem>>, vector<16x128xf32>
    %c0_6 = arith.constant 0 : index
    %c0_7 = arith.constant 0 : index
    %8 = vector.load %arg4[%c0_6, %c0_7] : memref<16x128xf32, #tpu.memory_space<vmem>>, vector<16x128xf32>
    %c0_i32_8 = arith.constant 0 : i32
    %9 = arith.cmpi eq, %arg0, %c0_i32_8 : i32
    %10 = arith.extui %9 : i1 to i32
    %c0_i32_9 = arith.constant 0 : i32
    %11 = arith.cmpi ne, %10, %c0_i32_9 : i32
    scf.if %11 {
      %c0_11 = arith.constant 0 : index
      %c0_12 = arith.constant 0 : index
      %c0_13 = arith.constant 0 : index
      %15 = vector.load %arg6[%c0_11, %c0_12, %c0_13] : memref<3x8x128xf32, #tpu.memory_space<vmem>>, vector<1x8x128xf32>
      %16 = vector.shape_cast %15 : vector<1x8x128xf32> to vector<8x128xf32>
      %17 = vector.shape_cast %6 : vector<16x128xf32> to vector<2x8x128xf32>
      %cst = arith.constant dense<0.000000e+00> : vector<8x128xf32>
      %18 = vector.multi_reduction <add>, %17, %cst [0] : vector<2x8x128xf32> to vector<8x128xf32>
      %19 = arith.addf %16, %18 : vector<8x128xf32>
      %c0_14 = arith.constant 0 : index
      %c0_15 = arith.constant 0 : index
      %c0_16 = arith.constant 0 : index
      %20 = vector.load %arg6[%c0_14, %c0_15, %c0_16] : memref<3x8x128xf32, #tpu.memory_space<vmem>>, vector<1x8x128xf32>
      %21 = vector.shape_cast %20 : vector<1x8x128xf32> to vector<8x128xf32>
      %22 = vector.shape_cast %19 : vector<8x128xf32> to vector<1x8x128xf32>
      tpu.vector_store %arg6[%c0_14, %c0_15, %c0_16], %22 {strides = array<i32>} : memref<3x8x128xf32, #tpu.memory_space<vmem>>, vector<1x8x128xf32>,
      %c1 = arith.constant 1 : index
      %c0_17 = arith.constant 0 : index
      %c0_18 = arith.constant 0 : index
      %23 = vector.load %arg6[%c1, %c0_17, %c0_18] : memref<3x8x128xf32, #tpu.memory_space<vmem>>, vector<1x8x128xf32>
      %24 = vector.shape_cast %23 : vector<1x8x128xf32> to vector<8x128xf32>
      %25 = vector.shape_cast %7 : vector<16x128xf32> to vector<2x8x128xf32>
      %cst_19 = arith.constant dense<0.000000e+00> : vector<8x128xf32>
      %26 = vector.multi_reduction <add>, %25, %cst_19 [0] : vector<2x8x128xf32> to vector<8x128xf32>
      %27 = arith.addf %24, %26 : vector<8x128xf32>
      %c1_20 = arith.constant 1 : index
      %c0_21 = arith.constant 0 : index
      %c0_22 = arith.constant 0 : index
      %28 = vector.load %arg6[%c1_20, %c0_21, %c0_22] : memref<3x8x128xf32, #tpu.memory_space<vmem>>, vector<1x8x128xf32>
      %29 = vector.shape_cast %28 : vector<1x8x128xf32> to vector<8x128xf32>
      %30 = vector.shape_cast %27 : vector<8x128xf32> to vector<1x8x128xf32>
      tpu.vector_store %arg6[%c1_20, %c0_21, %c0_22], %30 {strides = array<i32>} : memref<3x8x128xf32, #tpu.memory_space<vmem>>, vector<1x8x128xf32>,
      %c2 = arith.constant 2 : index
      %c0_23 = arith.constant 0 : index
      %c0_24 = arith.constant 0 : index
      %31 = vector.load %arg6[%c2, %c0_23, %c0_24] : memref<3x8x128xf32, #tpu.memory_space<vmem>>, vector<1x8x128xf32>
      %32 = vector.shape_cast %31 : vector<1x8x128xf32> to vector<8x128xf32>
      %33 = vector.shape_cast %8 : vector<16x128xf32> to vector<2x8x128xf32>
      %cst_25 = arith.constant dense<0.000000e+00> : vector<8x128xf32>
      %34 = vector.multi_reduction <add>, %33, %cst_25 [0] : vector<2x8x128xf32> to vector<8x128xf32>
      %35 = arith.addf %32, %34 : vector<8x128xf32>
      %c2_26 = arith.constant 2 : index
      %c0_27 = arith.constant 0 : index
      %c0_28 = arith.constant 0 : index
      %36 = vector.load %arg6[%c2_26, %c0_27, %c0_28] : memref<3x8x128xf32, #tpu.memory_space<vmem>>, vector<1x8x128xf32>
      %37 = vector.shape_cast %36 : vector<1x8x128xf32> to vector<8x128xf32>
      %38 = vector.shape_cast %35 : vector<8x128xf32> to vector<1x8x128xf32>
      tpu.vector_store %arg6[%c2_26, %c0_27, %c0_28], %38 {strides = array<i32>} : memref<3x8x128xf32, #tpu.memory_space<vmem>>, vector<1x8x128xf32>,
      %39 = arith.extui %0 : i1 to i32
      %c0_i32_29 = arith.constant 0 : i32
      %40 = arith.cmpi ne, %39, %c0_i32_29 : i32
      scf.if %40 {
        %c0_30 = arith.constant 0 : index
        %c0_31 = arith.constant 0 : index
        %c0_32 = arith.constant 0 : index
        %41 = vector.load %arg6[%c0_30, %c0_31, %c0_32] : memref<3x8x128xf32, #tpu.memory_space<vmem>>, vector<1x8x128xf32>
        %42 = vector.shape_cast %41 : vector<1x8x128xf32> to vector<8x128xf32>
        %43 = vector.shape_cast %42 : vector<8x128xf32> to vector<1x8x128xf32>
        %cst_33 = arith.constant dense<0.000000e+00> : vector<1xf32>
        %44 = vector.multi_reduction <add>, %43, %cst_33 [1, 2] : vector<1x8x128xf32> to vector<1xf32>
        %45 = vector.shape_cast %44 : vector<1xf32> to vector<1x1x1xf32>
        %46 = vector.extract %45[0, 0, 0] : f32 from vector<1x1x1xf32>
        %cst_34 = arith.constant 4.8828125E-4 : f32
        %47 = arith.mulf %46, %cst_34 : f32
        %c0_35 = arith.constant 0 : index
        %48 = memref.load %arg8[%c0_35] : memref<3xf32, #tpu.memory_space<smem>>
        memref.store %47, %arg8[%c0_35] : memref<3xf32, #tpu.memory_space<smem>>
        %c1_36 = arith.constant 1 : index
        %c0_37 = arith.constant 0 : index
        %c0_38 = arith.constant 0 : index
        %49 = vector.load %arg6[%c1_36, %c0_37, %c0_38] : memref<3x8x128xf32, #tpu.memory_space<vmem>>, vector<1x8x128xf32>
        %50 = vector.shape_cast %49 : vector<1x8x128xf32> to vector<8x128xf32>
        %51 = vector.shape_cast %50 : vector<8x128xf32> to vector<1x8x128xf32>
        %cst_39 = arith.constant dense<0.000000e+00> : vector<1xf32>
        %52 = vector.multi_reduction <add>, %51, %cst_39 [1, 2] : vector<1x8x128xf32> to vector<1xf32>
        %53 = vector.shape_cast %52 : vector<1xf32> to vector<1x1x1xf32>
        %54 = vector.extract %53[0, 0, 0] : f32 from vector<1x1x1xf32>
        %cst_40 = arith.constant 4.8828125E-4 : f32
        %55 = arith.mulf %54, %cst_40 : f32
        %c1_41 = arith.constant 1 : index
        %56 = memref.load %arg8[%c1_41] : memref<3xf32, #tpu.memory_space<smem>>
        memref.store %55, %arg8[%c1_41] : memref<3xf32, #tpu.memory_space<smem>>
        %c2_42 = arith.constant 2 : index
        %c0_43 = arith.constant 0 : index
        %c0_44 = arith.constant 0 : index
        %57 = vector.load %arg6[%c2_42, %c0_43, %c0_44] : memref<3x8x128xf32, #tpu.memory_space<vmem>>, vector<1x8x128xf32>
        %58 = vector.shape_cast %57 : vector<1x8x128xf32> to vector<8x128xf32>
        %59 = vector.shape_cast %58 : vector<8x128xf32> to vector<1x8x128xf32>
        %cst_45 = arith.constant dense<0.000000e+00> : vector<1xf32>
        %60 = vector.multi_reduction <add>, %59, %cst_45 [1, 2] : vector<1x8x128xf32> to vector<1xf32>
        %61 = vector.shape_cast %60 : vector<1xf32> to vector<1x1x1xf32>
        %62 = vector.extract %61[0, 0, 0] : f32 from vector<1x1x1xf32>
        %cst_46 = arith.constant 4.8828125E-4 : f32
        %63 = arith.mulf %62, %cst_46 : f32
        %c2_47 = arith.constant 2 : index
        %64 = memref.load %arg8[%c2_47] : memref<3xf32, #tpu.memory_space<smem>>
        memref.store %63, %arg8[%c2_47] : memref<3xf32, #tpu.memory_space<smem>>
      } else {
      }
    } else {
    }
    %c1_i32 = arith.constant 1 : i32
    %12 = arith.cmpi eq, %arg0, %c1_i32 : i32
    %13 = arith.extui %12 : i1 to i32
    %c0_i32_10 = arith.constant 0 : i32
    %14 = arith.cmpi ne, %13, %c0_i32_10 : i32
    scf.if %14 {
      %c0_11 = arith.constant 0 : index
      %15 = memref.load %arg8[%c0_11] : memref<3xf32, #tpu.memory_space<smem>>
      %c1 = arith.constant 1 : index
      %16 = memref.load %arg8[%c1] : memref<3xf32, #tpu.memory_space<smem>>
      %c2 = arith.constant 2 : index
      %17 = memref.load %arg8[%c2] : memref<3xf32, #tpu.memory_space<smem>>
      %18 = vector.broadcast %16 : f32 to vector<16x128xf32>
      %19 = arith.subf %18, %6 : vector<16x128xf32>
      %cst = arith.constant 0.000000e+00 : f32
      %20 = vector.broadcast %cst : f32 to vector<16x128xf32>
      %21 = arith.maximumf %19, %20 : vector<16x128xf32>
      %22 = math.absf %19 : vector<16x128xf32>
      %cst_12 = arith.constant 0.000000e+00 : f32
      %23 = vector.broadcast %cst_12 : f32 to vector<16x128xf32>
      %24 = arith.subf %23, %22 : vector<16x128xf32>
      %25 = math.exp %24 : vector<16x128xf32>
      %26 = math.log1p %25 : vector<16x128xf32>
      %27 = arith.addf %21, %26 : vector<16x128xf32>
      %28 = vector.broadcast %15 : f32 to vector<16x128xf32>
      %29 = arith.subf %7, %28 : vector<16x128xf32>
      %cst_13 = arith.constant 0.000000e+00 : f32
      %30 = vector.broadcast %cst_13 : f32 to vector<16x128xf32>
      %31 = arith.maximumf %29, %30 : vector<16x128xf32>
      %32 = math.absf %29 : vector<16x128xf32>
      %cst_14 = arith.constant 0.000000e+00 : f32
      %33 = vector.broadcast %cst_14 : f32 to vector<16x128xf32>
      %34 = arith.subf %33, %32 : vector<16x128xf32>
      %35 = math.exp %34 : vector<16x128xf32>
      %36 = math.log1p %35 : vector<16x128xf32>
      %37 = arith.addf %31, %36 : vector<16x128xf32>
      %38 = arith.addf %27, %37 : vector<16x128xf32>
      %39 = vector.broadcast %17 : f32 to vector<16x128xf32>
      %40 = arith.subf %6, %39 : vector<16x128xf32>
      %cst_15 = arith.constant 0.000000e+00 : f32
      %41 = vector.broadcast %cst_15 : f32 to vector<16x128xf32>
      %42 = arith.maximumf %40, %41 : vector<16x128xf32>
      %43 = math.absf %40 : vector<16x128xf32>
      %cst_16 = arith.constant 0.000000e+00 : f32
      %44 = vector.broadcast %cst_16 : f32 to vector<16x128xf32>
      %45 = arith.subf %44, %43 : vector<16x128xf32>
      %46 = math.exp %45 : vector<16x128xf32>
      %47 = math.log1p %46 : vector<16x128xf32>
      %48 = arith.addf %42, %47 : vector<16x128xf32>
      %49 = vector.broadcast %15 : f32 to vector<16x128xf32>
      %50 = arith.subf %49, %8 : vector<16x128xf32>
      %cst_17 = arith.constant 0.000000e+00 : f32
      %51 = vector.broadcast %cst_17 : f32 to vector<16x128xf32>
      %52 = arith.maximumf %50, %51 : vector<16x128xf32>
      %53 = math.absf %50 : vector<16x128xf32>
      %cst_18 = arith.constant 0.000000e+00 : f32
      %54 = vector.broadcast %cst_18 : f32 to vector<16x128xf32>
      %55 = arith.subf %54, %53 : vector<16x128xf32>
      %56 = math.exp %55 : vector<16x128xf32>
      %57 = math.log1p %56 : vector<16x128xf32>
      %58 = arith.addf %52, %57 : vector<16x128xf32>
      %59 = arith.addf %48, %58 : vector<16x128xf32>
      %c0_19 = arith.constant 0 : index
      %c0_20 = arith.constant 0 : index
      %c0_21 = arith.constant 0 : index
      %60 = vector.load %arg7[%c0_19, %c0_20, %c0_21] : memref<2x8x128xf32, #tpu.memory_space<vmem>>, vector<1x8x128xf32>
      %61 = vector.shape_cast %60 : vector<1x8x128xf32> to vector<8x128xf32>
      %62 = vector.shape_cast %38 : vector<16x128xf32> to vector<2x8x128xf32>
      %cst_22 = arith.constant dense<0.000000e+00> : vector<8x128xf32>
      %63 = vector.multi_reduction <add>, %62, %cst_22 [0] : vector<2x8x128xf32> to vector<8x128xf32>
      %64 = arith.addf %61, %63 : vector<8x128xf32>
      %c0_23 = arith.constant 0 : index
      %c0_24 = arith.constant 0 : index
      %c0_25 = arith.constant 0 : index
      %65 = vector.load %arg7[%c0_23, %c0_24, %c0_25] : memref<2x8x128xf32, #tpu.memory_space<vmem>>, vector<1x8x128xf32>
      %66 = vector.shape_cast %65 : vector<1x8x128xf32> to vector<8x128xf32>
      %67 = vector.shape_cast %64 : vector<8x128xf32> to vector<1x8x128xf32>
      tpu.vector_store %arg7[%c0_23, %c0_24, %c0_25], %67 {strides = array<i32>} : memref<2x8x128xf32, #tpu.memory_space<vmem>>, vector<1x8x128xf32>,
      %c1_26 = arith.constant 1 : index
      %c0_27 = arith.constant 0 : index
      %c0_28 = arith.constant 0 : index
      %68 = vector.load %arg7[%c1_26, %c0_27, %c0_28] : memref<2x8x128xf32, #tpu.memory_space<vmem>>, vector<1x8x128xf32>
      %69 = vector.shape_cast %68 : vector<1x8x128xf32> to vector<8x128xf32>
      %70 = vector.shape_cast %59 : vector<16x128xf32> to vector<2x8x128xf32>
      %cst_29 = arith.constant dense<0.000000e+00> : vector<8x128xf32>
      %71 = vector.multi_reduction <add>, %70, %cst_29 [0] : vector<2x8x128xf32> to vector<8x128xf32>
      %72 = arith.addf %69, %71 : vector<8x128xf32>
      %c1_30 = arith.constant 1 : index
      %c0_31 = arith.constant 0 : index
      %c0_32 = arith.constant 0 : index
      %73 = vector.load %arg7[%c1_30, %c0_31, %c0_32] : memref<2x8x128xf32, #tpu.memory_space<vmem>>, vector<1x8x128xf32>
      %74 = vector.shape_cast %73 : vector<1x8x128xf32> to vector<8x128xf32>
      %75 = vector.shape_cast %72 : vector<8x128xf32> to vector<1x8x128xf32>
      tpu.vector_store %arg7[%c1_30, %c0_31, %c0_32], %75 {strides = array<i32>} : memref<2x8x128xf32, #tpu.memory_space<vmem>>, vector<1x8x128xf32>,
      %76 = arith.extui %0 : i1 to i32
      %c0_i32_33 = arith.constant 0 : i32
      %77 = arith.cmpi ne, %76, %c0_i32_33 : i32
      scf.if %77 {
        %c0_34 = arith.constant 0 : index
        %c0_35 = arith.constant 0 : index
        %c0_36 = arith.constant 0 : index
        %78 = vector.load %arg7[%c0_34, %c0_35, %c0_36] : memref<2x8x128xf32, #tpu.memory_space<vmem>>, vector<1x8x128xf32>
        %79 = vector.shape_cast %78 : vector<1x8x128xf32> to vector<8x128xf32>
        %80 = vector.shape_cast %79 : vector<8x128xf32> to vector<1x8x128xf32>
        %cst_37 = arith.constant dense<0.000000e+00> : vector<1xf32>
        %81 = vector.multi_reduction <add>, %80, %cst_37 [1, 2] : vector<1x8x128xf32> to vector<1xf32>
        %82 = vector.shape_cast %81 : vector<1xf32> to vector<1x1x1xf32>
        %83 = vector.extract %82[0, 0, 0] : f32 from vector<1x1x1xf32>
        %cst_38 = arith.constant 2.44140625E-4 : f32
        %84 = arith.mulf %83, %cst_38 : f32
        %c0_39 = arith.constant 0 : index
        %85 = memref.load %arg5[%c0_39] : memref<2xf32, #tpu.memory_space<smem>>
        memref.store %84, %arg5[%c0_39] : memref<2xf32, #tpu.memory_space<smem>>
        %c1_40 = arith.constant 1 : index
        %c0_41 = arith.constant 0 : index
        %c0_42 = arith.constant 0 : index
        %86 = vector.load %arg7[%c1_40, %c0_41, %c0_42] : memref<2x8x128xf32, #tpu.memory_space<vmem>>, vector<1x8x128xf32>
        %87 = vector.shape_cast %86 : vector<1x8x128xf32> to vector<8x128xf32>
        %88 = vector.shape_cast %87 : vector<8x128xf32> to vector<1x8x128xf32>
        %cst_43 = arith.constant dense<0.000000e+00> : vector<1xf32>
        %89 = vector.multi_reduction <add>, %88, %cst_43 [1, 2] : vector<1x8x128xf32> to vector<1xf32>
        %90 = vector.shape_cast %89 : vector<1xf32> to vector<1x1x1xf32>
        %91 = vector.extract %90[0, 0, 0] : f32 from vector<1x1x1xf32>
        %cst_44 = arith.constant 2.44140625E-4 : f32
        %92 = arith.mulf %91, %cst_44 : f32
        %c1_45 = arith.constant 1 : index
        %93 = memref.load %arg5[%c1_45] : memref<2xf32, #tpu.memory_space<smem>>
        memref.store %92, %arg5[%c1_45] : memref<2xf32, #tpu.memory_space<smem>>
      } else {
      }
    } else {
    }
    return
  }
  func.func @transform_0(%arg0: i32, %arg1: i32) -> (i32, i32) {
    %c0_i32 = arith.constant 0 : i32
    %c0_i32_0 = arith.constant 0 : i32
    return %arg1, %c0_i32 : i32, i32
  }
  func.func @transform_1(%arg0: i32, %arg1: i32) -> (i32, i32) {
    %c0_i32 = arith.constant 0 : i32
    %c0_i32_0 = arith.constant 0 : i32
    return %arg1, %c0_i32 : i32, i32
  }
  func.func @transform_2(%arg0: i32, %arg1: i32) -> (i32, i32) {
    %c0_i32 = arith.constant 0 : i32
    %c0_i32_0 = arith.constant 0 : i32
    return %arg1, %c0_i32 : i32, i32
  }
  func.func @transform_3(%arg0: i32, %arg1: i32) -> i32 {
    %c0_i32 = arith.constant 0 : i32
    %c0_i32_0 = arith.constant 0 : i32
    return %c0_i32 : i32
  }
}

</mosaic_0001>

<bundles_post_ra>
// kernel: tpu_custom_call.1
= control target key start
LH: loop header
LB: loop body
LE: loop exit
PB: predicated region body
PF: predicated region fallthrough
CT: control target
= control target key end

     0   :  { %8 = vsyncpa [#allocation6], 0  ;;  %s1035_s0 = inlined_call_operand.hbm [shape: f32[16,128], index: 0, kind: input, shape index: {}]   ;;  %s1036_s1 = inlined_call_operand.hbm [shape: f32[16,128], index: 1, kind: input, shape index: {}]   ;;  %s1037_s2 = inlined_call_operand.hbm [shape: f32[16,128], index: 2, kind: input, shape index: {}]   ;;  %s1038_s3 = inlined_call_operand.hbm [shape: f32[2], index: 3, kind: output, shape index: {}]  }
   0x1   :  { %9 = vsyncpa [#allocation9], 0 }
   0x2   :  { %10 = vsyncpa [#allocation7], 0  ;;  %s856_s12 = smov 0   ;;  %s858_s13 = smov 0  }
   0x3   :  { %s860_s14 = smov 0  }
   0x4 LB: > { %s563_s15 = sadd.s32 4294967295, %s827_s14   ;;  %p564_p0 = scmp.ge.s32.totalorder %s827_s14, 1  ;;  %s827_s14 = sphi %s860_s14, %s16_s14   ;;  %s823_s13 = sphi %s858_s13, %s1055_s13   ;;  %s819_s12 = sphi %s856_s12, %s1054_s12  }
   0x5   : > { %p132_p1 = scmp.lt.s32.totalorder %s827_s14, 3  ;;  %p876_p2 = scmp.eq.s32.totalorder %s563_s15, 0 }
   0x6   : > { %s163_s19 = sshll.u32 %s1036_s1, 4  ;;  %s829_s21 = smov [#allocation8]   ;;  %s164_s19 = int_to_ptr.hbm [resolvable:$true] %s163_s19 }
   0x7   : > { %p883_p3 = pnand %p564_p0, %p132_p1  ;;  %s165_s22 = sshll.u32 %s829_s21, 4  ;;  %s166_s22 = int_to_ptr.vmem [resolvable:$true] %s165_s22 }
   0x8   : > { %s28_s24 = sadd.s32 1, %s823_s13  ;;  %s830_s25 = smov 128  }
   0x9   : > { %p608_p4 = pneg %p883_p3  ;;  %p30_p6 = scmp.ge.s32.totalorder %s28_s24, 2 }
   0xa   : > { %s831_s26 = smov 8   ;;  %s146_s29 = sshll.u32 %s1035_s0, 4  ;;  %s147_s29 = int_to_ptr.hbm [resolvable:$true] %s146_s29 }
   0xb   : > { %p891_p5 = pnand %p876_p2, %p608_p4  ;;  %s1057_s24 = smov (%p30_p6, %s28_s24), 0 }
   0xc   : > { %s832_s30 = smov [#allocation5]   ;;  %s180_s7 = sshll.u32 %s1037_s2, 4  ;;  %s181_s7 = int_to_ptr.hbm [resolvable:$true] %s180_s7 }
   0xd   : > { %614 = dma.hbm_to_vmem [thread:$0]  (!%p891_p5), %s164_s19, 256, %s166_s22, [#allocation9], %s830_s25, %s830_s25, %s831_s26  }
   0xe   : > { %s148_s4 = sshll.u32 %s832_s30, 4  ;;  %s833_s8 = smov [#allocation10]   ;;  %s149_s4 = int_to_ptr.vmem [resolvable:$true] %s148_s4 }
   0xf   : > { %611 = dma.hbm_to_vmem [thread:$0]  (!%p891_p5), %s147_s29, 256, %s149_s4, [#allocation6], %s830_s25, %s830_s25, %s831_s26  }
  0x10   : > { %s182_s9 = sshll.u32 %s833_s8, 4  ;;  %198 = sbr.rel (%p883_p3) target bundleno = 475 (0x1db), region = 32  ;;  %s183_s9 = int_to_ptr.vmem [resolvable:$true] %s182_s9 }
  0x11   : > { %617 = dma.hbm_to_vmem [thread:$0]  (!%p891_p5), %s181_s7, 256, %s183_s9, [#allocation9], %s830_s25, %s830_s25, %s831_s26  }
  0x15   : > { %806 = dma.done.wait (%p876_p2), [#allocation6], 256  }
  0x16   : > { %808 = vsyncadd (%p876_p2), [#allocation6], 4294967040 }
  0x17   : > { %810 = dma.done.wait (%p876_p2), [#allocation9], 512  }
  0x18   : > { %812 = vsyncadd (%p876_p2), [#allocation9], 4294966784  ;;  %p227_p7 = scmp.eq.s32.totalorder %s819_s12, 0 }
  0x19   : > { %v834_v0 = vmov (%p227_p7), 0.0  }
  0x1a   : > { %231 = sbr.rel (!%p227_p7) target bundleno = 31 (0x1f), region = 48  ;;  %232 = vst [vmem:[#allocation2 + $0x10] sm:$0xff] (%p227_p7), %v834_v0 }
  0x1b   : > { %233 = vst [vmem:[#allocation2] sm:$0xff] (%p227_p7), %v834_v0 }
  0x1c   : > { %234 = vst [vmem:[#allocation2 + $0x8] sm:$0xff] (%p227_p7), %v834_v0 }
  0x1d   : > { %235 = vst [vmem:[#allocation3 + $0x8] sm:$0xff] (%p227_p7), %v834_v0 }
  0x1e   : > { %236 = vst [vmem:[#allocation3] sm:$0xff] (%p227_p7), %v834_v0 }
  0x1f PF: > { %v921_v1 = vld [vmem:[#allocation5] sm:$0xff]  ;;  %v923_v2 = vld [vmem:[#allocation5 + $0x8] sm:$0xff]  ;;  %v239_v3 = vld [vmem:[#allocation8] sm:$0xff]  ;;  %p573_p8 = scmp.ne.s32.totalorder %s819_s12, 0 }
  0x20   : > { %v240_v4 = vld [vmem:[#allocation8 + $0x8] sm:$0xff]  ;;  %v241_v5 = vld [vmem:[#allocation10] sm:$0xff]  ;;  %v925_v6 = vld [vmem:[#allocation10 + $0x8] sm:$0xff] }
  0x21   : > { %245 = sbr.rel (%p573_p8) target bundleno = 232 (0xe8), region = 52 }
  0x26   : > { %v246_v7 = vld [vmem:[#allocation2 + $0x10] sm:$0xff]  ;;  %v247_v8 = vadd.f32 %v923_v2, %v921_v1  ;;  %v256_v9 = vld [vmem:[#allocation2 + $0x8] sm:$0xff]  ;;  %v257_v10 = vadd.f32 %v925_v6, %v241_v5  ;;  %v252_v11 = vadd.f32 %v240_v4, %v239_v3  ;;  %v251_v12 = vld [vmem:[#allocation2] sm:$0xff] }
  0x28   : > { %v248_v13 = vadd.f32 %v247_v8, %v246_v7  ;;  %v258_v14 = vadd.f32 %v257_v10, %v256_v9  ;;  %v253_v15 = vadd.f32 %v252_v11, %v251_v12 }
  0x2a   : > { %249 = vst [vmem:[#allocation2 + $0x10] sm:$0xff] %v248_v13  ;;  %264 = vadd.xlane.f32.xlu0 %v248_v13  ;;  %290 = vadd.xlane.f32.xlu1 %v258_v14 }
  0x2b   : > { %259 = vst [vmem:[#allocation2 + $0x8] sm:$0xff] %v258_v14 }
  0x2c   : > { %254 = vst [vmem:[#allocation2] sm:$0xff] %v253_v15 }
  0x32   : > { %277 = vadd.xlane.f32.xlu0 %v253_v15 }
  0x9d   : > { %v265_v16 = vpop.xlane.xlu0 %264  ;;  %v291_v17 = vpop.xlane.xlu1 %290 }
  0x9e   : > { %v266_v18 = vrot.slane %v265_v16, 4  ;;  %v292_v19 = vrot.slane %v291_v17, 4 }
  0xa0   : > { %v267_v20 = vadd.f32 %v266_v18, %v265_v16  ;;  %v293_v21 = vadd.f32 %v292_v19, %v291_v17 }
  0xa2   : > { %v268_v22 = vrot.slane %v267_v20, 2  ;;  %v294_v24 = vrot.slane %v293_v21, 2 }
  0xa4   : > { %v269_v23 = vadd.f32 %v268_v22, %v267_v20  ;;  %v295_v30 = vadd.f32 %v294_v24, %v293_v21 }
  0xa5   : > { %v278_v25 = vpop.xlane.xlu0 %277 }
  0xa6   : > { %v279_v26 = vrot.slane %v278_v25, 4  ;;  %v270_v27 = vrot.slane %v269_v23, 1  ;;  %v296_v33 = vrot.slane %v295_v30, 1 }
  0xa8   : > { %v280_v28 = vadd.f32 %v279_v26, %v278_v25  ;;  %v271_v29 = vadd.f32 %v270_v27, %v269_v23  ;;  %v297_v36 = vadd.f32 %v296_v33, %v295_v30 }
  0xaa   : > { %v281_v31 = vrot.slane %v280_v28, 2  ;;  %582 = vpush %v271_v29 }
  0xac   : > { %v282_v32 = vadd.f32 %v281_v31, %v280_v28 }
  0xae   : > { %v283_v34 = vrot.slane %v282_v32, 1 }
  0xb0   : > { %v284_v35 = vadd.f32 %v283_v34, %v282_v32 }
  0xb2   : > { %584 = vpush %v284_v35 }
  0xb3   : > { %586 = vpush %v297_v36 }
  0xdb   : > { %s583_s10 = spop %582 }
  0xdc   : > { %s273_s11 = smul.f32 0.00048828125, %s583_s10 }
  0xde   : > { %275 = sst [smem:[#allocation4]] %s273_s11 }
  0xe3   : > { %s585_s16 = spop %584 }
  0xe4   : > { %s286_s17 = smul.f32 0.00048828125, %s585_s16  ;;  %s587_s18 = spop %586 }
  0xe5   : > { %s299_s19 = smul.f32 0.00048828125, %s587_s18 }
  0xe6   : > { %288 = sst [smem:[#allocation4 + $0x1]] %s286_s17 }
  0xe7   : > { %301 = sst [smem:[#allocation4 + $0x2]] %s299_s19 }
  0xe8 PF: > { %p574_p9 = scmp.ne.s32.totalorder %s819_s12, 1 }
  0xe9   : > { %s306_s20 = sld [smem:[#allocation4]] (!%p574_p9) }
  0xea   : > { %305 = sbr.rel (%p574_p9) target bundleno = 469 (0x1d5), region = 60  ;;  %s575_s21 = sld [smem:[#allocation4 + $0x1]] (!%p574_p9) }
  0xeb   : > { %s576_s22 = sld [smem:[#allocation4 + $0x2]] (!%p574_p9) }
  0xef   : > { %v342_v37 = vstv %s306_s20 }
  0xf0   : > { %v309_v38 = vstv %s575_s21  ;;  %v932_v39 = vsub.f32 %v239_v3, %v342_v37  ;;  %v934_v40 = vsub.f32 %v240_v4, %v342_v37  ;;  %v936_v41 = vsub.f32 %v342_v37, %v241_v5 }
  0xf1   : > { %v939_v42 = vsub.f32 %v309_v38, %v921_v1  ;;  %v942_v43 = vsub.f32 %v309_v38, %v923_v2  ;;  %v377_v44 = vstv %s576_s22  ;;  %v945_v45 = vsub.f32 %v342_v37, %v925_v6 }
  0xf2   : > { %v347_v46 = vand.u32 2147483647, %v932_v39  ;;  %v348_v47 = vand.u32 2147483647, %v934_v40  ;;  %v952_v52 = vsub.f32 %v921_v1, %v377_v44  ;;  %v955_v53 = vsub.f32 %v923_v2, %v377_v44 }
  0xf3   : > { %v314_v48 = vand.u32 2147483647, %v939_v42  ;;  %v315_v49 = vand.u32 2147483647, %v942_v43  ;;  %v414_v56 = vand.u32 2147483647, %v936_v41 }
  0xf4   : > { %v349_v50 = vsub.f32 0.0, %v347_v46  ;;  %v350_v51 = vsub.f32 0.0, %v348_v47  ;;  %v415_v57 = vand.u32 2147483647, %v945_v45  ;;  %v382_v62 = vand.u32 2147483647, %v952_v52 }
  0xf5   : > { %v316_v54 = vsub.f32 0.0, %v314_v48  ;;  %v317_v55 = vsub.f32 0.0, %v315_v49  ;;  %v383_v63 = vand.u32 2147483647, %v955_v53  ;;  %v416_v1 = vsub.f32 0.0, %v414_v56 }
  0xf6   : > { %v351_v58 = vmul.f32 1.442695, %v349_v50  ;;  %v353_v59 = vmul.f32 1.442695, %v350_v51  ;;  %v384_v0 = vsub.f32 0.0, %v382_v62  ;;  %v417_v2 = vsub.f32 0.0, %v415_v57 }
  0xf7   : > { %v318_v60 = vmul.f32 1.442695, %v316_v54  ;;  %v320_v61 = vmul.f32 1.442695, %v317_v55  ;;  %v385_v3 = vsub.f32 0.0, %v383_v63  ;;  %v345_v10 = vmax.f32 %v932_v39, 0.0 }
  0xf8   : > { %657 = vpow2.f32 %v351_v58  ;;  %v386_v4 = vmul.f32 1.442695, %v384_v0  ;;  %v418_v5 = vmul.f32 1.442695, %v416_v1  ;;  %v420_v7 = vmul.f32 1.442695, %v417_v2 }
  0xf9   : > { %659 = vpow2.f32 %v318_v60  ;;  %v388_v6 = vmul.f32 1.442695, %v385_v3  ;;  %v346_v22 = vmax.f32 %v934_v40, 0.0  ;;  %v312_v25 = vmax.f32 %v939_v42, 0.0 }
  0xfa   : > { %661 = vpow2.f32 %v320_v61  ;;  %v313_v26 = vmax.f32 %v942_v43, 0.0  ;;  %v412_v40 = vmax.f32 %v936_v41, 0.0 }
  0xfb   : > { %663 = vpow2.f32 %v353_v59 }
  0xfc   : > { %665 = vpow2.f32 %v386_v4 }
  0xfd   : > { %667 = vpow2.f32 %v388_v6 }
  0xfe   : > { %v658_v8 = vpop.eup %657  ;;  %669 = vpow2.f32 %v418_v5 }
  0xff   : > { %v660_v9 = vpop.eup %659  ;;  %v355_v11 = vadd.f32 1.0, %v658_v8  ;;  %v358_v12 = vmul.f32 -0.5, %v658_v8  ;;  %671 = vpow2.f32 %v420_v7  ;;  %v361_v20 = vand.u32 2147483647, %v658_v8 }
 0x100   : > { %v662_v13 = vpop.eup %661  ;;  %v322_v14 = vadd.f32 1.0, %v660_v9  ;;  %v325_v15 = vmul.f32 -0.5, %v660_v9  ;;  %v328_v16 = vand.u32 2147483647, %v660_v9 }
 0x101   : > { %v664_v17 = vpop.eup %663  ;;  %v331_v18 = vadd.f32 1.0, %v662_v13  ;;  %v334_v19 = vmul.f32 -0.5, %v662_v13  ;;  %673 = vlog2.f32 %v355_v11  ;;  %v359_v23 = vadd.f32 1.0, %v358_v12 }
 0x102   : > { %675 = vlog2.f32 %v322_v14  ;;  %v326_v21 = vadd.f32 1.0, %v325_v15  ;;  %v666_v24 = vpop.eup %665  ;;  %v337_v27 = vand.u32 2147483647, %v662_v13  ;;  %vm965_vm0 = vcmp.lt.f32.partialorder %v328_v16, 0.0004427343 }
 0x103   : > { %677 = vlog2.f32 %v331_v18  ;;  %v668_v28 = vpop.eup %667  ;;  %v335_v30 = vadd.f32 1.0, %v334_v19  ;;  %v364_v31 = vadd.f32 1.0, %v664_v17  ;;  %v367_v32 = vmul.f32 -0.5, %v664_v17 }
 0x104   : > { %v969_v33 = vpop.eup %669  ;;  %vm971_vm1 = vcmp.lt.f32.partialorder %v361_v20, 0.0004427343  ;;  %v370_v35 = vand.u32 2147483647, %v664_v17  ;;  %v390_v36 = vadd.f32 1.0, %v666_v24  ;;  %v393_v37 = vmul.f32 -0.5, %v666_v24 }
 0x105   : > { %v975_v38 = vpop.eup %671  ;;  %v327_v42 = vmul.f32 %v660_v9, %v326_v21  ;;  %v360_v43 = vmul.f32 %v658_v8, %v359_v23  ;;  %679 = vlog2.f32 %v364_v31  ;;  %v399_v44 = vadd.f32 1.0, %v668_v28 }
 0x106   : > { %v368_v47 = vadd.f32 1.0, %v367_v32  ;;  %681 = vlog2.f32 %v390_v36  ;;  %v394_v48 = vadd.f32 1.0, %v393_v37  ;;  %v402_v49 = vmul.f32 -0.5, %v668_v28 }
 0x107   : > { %v674_v46 = vpop.eup %673  ;;  %v336_v51 = vmul.f32 %v662_v13, %v335_v30  ;;  %vm977_vm2 = vcmp.lt.f32.partialorder %v337_v27, 0.0004427343  ;;  %683 = vlog2.f32 %v399_v44  ;;  %vm981_vm3 = vcmp.lt.f32.partialorder %v370_v35, 0.0004427343 }
 0x108   : > { %v676_v50 = vpop.eup %675  ;;  %v357_v55 = vmul.f32 0.6931472, %v674_v46  ;;  %v396_v59 = vand.u32 2147483647, %v666_v24  ;;  %v422_v62 = vadd.f32 1.0, %v969_v33  ;;  %v425_v63 = vmul.f32 -0.5, %v969_v33 }
 0x109   : > { %v678_v56 = vpop.eup %677  ;;  %v324_v57 = vmul.f32 0.6931472, %v676_v50  ;;  %v369_v1 = vmul.f32 %v664_v17, %v368_v47  ;;  %v395_v2 = vmul.f32 %v666_v24, %v394_v48  ;;  %v403_v3 = vadd.f32 1.0, %v402_v49 }
 0x10a   : > { %v333_v60 = vmul.f32 0.6931472, %v678_v56  ;;  %v363_v61 = vsel %vm971_vm1, %v360_v43, %v357_v55  ;;  %685 = vlog2.f32 %v422_v62  ;;  %v405_v11 = vand.u32 2147483647, %v668_v28 }
 0x10b   : > { %v330_v0 = vsel %vm965_vm0, %v327_v42, %v324_v57  ;;  %v680_v4 = vpop.eup %679  ;;  %v373_v7 = vadd.f32 %v363_v61, %v345_v10  ;;  %v426_v12 = vadd.f32 1.0, %v425_v63  ;;  %v431_v13 = vadd.f32 1.0, %v975_v38 }
 0x10c   : > { %v339_v5 = vsel %vm977_vm2, %v336_v51, %v333_v60  ;;  %v340_v6 = vadd.f32 %v330_v0, %v312_v25  ;;  %v682_v8 = vpop.eup %681  ;;  %v366_v9 = vmul.f32 0.6931472, %v680_v4  ;;  %v428_v17 = vand.u32 2147483647, %v969_v33  ;;  %v449_v51 = vld [vmem:[#allocation3] sm:$0xff] }
 0x10d   : > { %v684_v14 = vpop.eup %683  ;;  %v341_v15 = vadd.f32 %v339_v5, %v313_v26  ;;  %v392_v16 = vmul.f32 0.6931472, %v682_v8  ;;  %v434_v18 = vmul.f32 -0.5, %v975_v38  ;;  %vm1000_vm4 = vcmp.lt.f32.partialorder %v396_v59, 0.0004427343 }
 0x10e   : > { %v372_v19 = vsel %vm981_vm3, %v369_v1, %v366_v9  ;;  %v404_v10 = vmul.f32 %v668_v28, %v403_v3  ;;  %687 = vlog2.f32 %v431_v13  ;;  %v375_v21 = vadd.f32 %v373_v7, %v340_v6 }
 0x10f   : > { %v374_v20 = vadd.f32 %v372_v19, %v346_v22  ;;  %v401_v23 = vmul.f32 0.6931472, %v684_v14  ;;  %v435_v24 = vadd.f32 1.0, %v434_v18  ;;  %v380_v25 = vmax.f32 %v952_v52, 0.0  ;;  %v444_v22 = vld [vmem:[#allocation3 + $0x8] sm:$0xff] }
 0x110   : > { %vm1007_vm5 = vcmp.lt.f32.partialorder %v405_v11, 0.0004427343  ;;  %v427_v27 = vmul.f32 %v969_v33, %v426_v12  ;;  %v437_v29 = vand.u32 2147483647, %v975_v38  ;;  %v686_v30 = vpop.eup %685  ;;  %v398_v28 = vsel %vm1000_vm4, %v395_v2, %v392_v16 }
 0x111   : > { %v376_v31 = vadd.f32 %v374_v20, %v341_v15  ;;  %vm429_vm6 = vcmp.lt.f32.partialorder %v428_v17, 0.0004427343  ;;  %v381_v32 = vmax.f32 %v955_v53, 0.0  ;;  %v424_v52 = vmul.f32 0.6931472, %v686_v30 }
 0x112   : > { %v407_v35 = vsel %vm1007_vm5, %v404_v10, %v401_v23  ;;  %v436_v33 = vmul.f32 %v975_v38, %v435_v24  ;;  %v408_v37 = vadd.f32 %v398_v28, %v380_v25  ;;  %v413_v42 = vmax.f32 %v945_v45, 0.0 }
 0x113   : > { %v445_v34 = vadd.f32 %v376_v31, %v375_v21  ;;  %v430_v43 = vsel %vm429_vm6, %v427_v27, %v424_v52  ;;  %vm438_vm7 = vcmp.lt.f32.partialorder %v437_v29, 0.0004427343  ;;  %v409_v47 = vadd.f32 %v407_v35, %v381_v32 }
 0x114   : > { %v688_v36 = vpop.eup %687  ;;  %v440_v41 = vadd.f32 %v430_v43, %v412_v40 }
 0x115   : > { %v446_v44 = vadd.f32 %v445_v34, %v444_v22  ;;  %v433_v46 = vmul.f32 0.6931472, %v688_v36 }
 0x116   : > { %v442_v49 = vadd.f32 %v440_v41, %v408_v37 }
 0x117   : > { %447 = vst [vmem:[#allocation3 + $0x8] sm:$0xff] %v446_v44  ;;  %457 = vadd.xlane.f32.xlu0 %v446_v44  ;;  %v439_v53 = vsel %vm438_vm7, %v436_v33, %v433_v46 }
 0x118   : > { %v441_v48 = vadd.f32 %v439_v53, %v413_v42 }
 0x11a   : > { %v443_v50 = vadd.f32 %v441_v48, %v409_v47 }
 0x11c   : > { %v450_v54 = vadd.f32 %v443_v50, %v442_v49 }
 0x11e   : > { %v451_v55 = vadd.f32 %v450_v54, %v449_v51 }
 0x120   : > { %452 = vst [vmem:[#allocation3] sm:$0xff] %v451_v55  ;;  %470 = vadd.xlane.f32.xlu0 %v451_v55 }
 0x18a   : > { %v458_v38 = vpop.xlane.xlu0 %457 }
 0x18b   : > { %v459_v56 = vrot.slane %v458_v38, 4 }
 0x18d   : > { %v460_v45 = vadd.f32 %v459_v56, %v458_v38 }
 0x18f   : > { %v461_v57 = vrot.slane %v460_v45, 2 }
 0x191   : > { %v462_v58 = vadd.f32 %v461_v57, %v460_v45 }
 0x193   : > { %v471_v59 = vpop.xlane.xlu0 %470  ;;  %v463_v60 = vrot.slane %v462_v58, 1 }
 0x194   : > { %v472_v61 = vrot.slane %v471_v59, 4 }
 0x195   : > { %v464_v62 = vadd.f32 %v463_v60, %v462_v58 }
 0x196   : > { %v473_v63 = vadd.f32 %v472_v61, %v471_v59 }
 0x197   : > { %588 = vpush %v464_v62 }
 0x198   : > { %v474_v0 = vrot.slane %v473_v63, 2 }
 0x19a   : > { %v475_v1 = vadd.f32 %v474_v0, %v473_v63 }
 0x19c   : > { %v476_v2 = vrot.slane %v475_v1, 1 }
 0x19e   : > { %v477_v3 = vadd.f32 %v476_v2, %v475_v1 }
 0x1a0   : > { %590 = vpush %v477_v3 }
 0x1c8   : > { %s589_s12 = spop %588 }
 0x1c9   : > { %s466_s23 = smul.f32 0.00024414063, %s589_s12 }
 0x1cb   : > { %468 = sst [smem:[#allocation11]] %s466_s23 }
 0x1d1   : > { %s591_s25 = spop %590 }
 0x1d2   : > { %s479_s26 = smul.f32 0.00024414063, %s591_s25 }
 0x1d4   : > { %481 = sst [smem:[#allocation11 + $0x1]] %s479_s26 }
 0x1d5 PF: > { %p624_p10 = scmp.eq.s32.totalorder %s563_s15, 1  ;;  %s488_s29 = sshll.u32 %s1038_s3, 4  ;;  %s489_s29 = int_to_ptr.hbm [resolvable:$true] %s488_s29 }
 0x1d6   : > { %s835_s30 = smov [#allocation11]  }
 0x1d7   : > { %605 = dma.smem_to_hbm (%p624_p10), %s835_s30, 16, %s489_s29, [#allocation7]  }
 0x1d8   : > { %814 = dma.done.wait (%p624_p10), [#allocation7], 16  }
 0x1d9   : > { %816 = vsyncadd (%p624_p10), [#allocation7], 4294967280 }
 0x1da   : > { %497 = sfence }
 0x1db PF: > { %s16_s14 = sadd.s32 1, %s827_s14   ;;  %s1054_s12 = smov %s823_s13 }
 0x1dc   : > { %p13_p11 = scmp.ge.s32.totalorder %s16_s14, 4   ;;  %s1055_s13 = smov %s1057_s24 }
 0x1de   :  { %15 = sbr.rel (!%p13_p11) target bundleno = 4 (0x4), region = 100 }
 0x1e3   :  { %503 = vsyncpa [#allocation6], 1 }
 0x1e4   :  { %505 = vsyncpa [#allocation6 + $0x1], 1 }
 0x1e5   :  { %506 = vsyncpa [#allocation9], 1 }
 0x1e6   :  { %507 = vsyncpa [#allocation7], 1 }
 0x1e7   :  { %509 = vsyncpa [#allocation7 + $0x1], 1 }

</bundles_post_ra>
